<compile_context>
chip_gen: v6e
topology: v6e:2x2x1
jax: 0.10.0
libtpu: 0.0.40
codegen_flags: <defaults>
</compile_context>

<pallas_src>
import functools

import jax
import jax.numpy as jnp
from jax.experimental import pallas as pl
from jax.experimental.pallas import tpu as pltpu


def _round_up(x: int, m: int) -> int:
    return (x + m - 1) // m * m


@functools.lru_cache(maxsize=1)
def _roll_moves_to_higher_lanes() -> bool:
    """One-time cached probe of pltpu.roll's rotate convention.

    We need out[:, j] = x[:, j + b]; depending on whether pltpu.roll follows
    the jnp.roll convention (positive shift moves data to higher lane indices)
    the required shift amount is (width - b) or b.  A 4 KiB probe kernel
    settles it robustly across backends.
    """
    def probe(x_ref, o_ref):
        o_ref[...] = pltpu.roll(x_ref[...], shift=1, axis=1)

    x = jnp.tile(jnp.arange(128, dtype=jnp.float32), (8, 1))
    out = pl.pallas_call(
        probe, out_shape=jax.ShapeDtypeStruct((8, 128), jnp.float32))(x)
    return bool(out[0, 1] == x[0, 0])   # jnp.roll convention -> True


@functools.lru_cache(maxsize=None)
def _build_correlate2d_valid(H, W, KH, KW, dtype_name, band_rows):
    """Build (and jit) the forward fn for one (H, W, KH, KW, dtype) signature."""
    dtype = jnp.dtype(dtype_name)
    OH, OW = H - KH + 1, W - KW + 1
    if OH < 1 or OW < 1:
        raise ValueError("filter does not fit inside the input ('valid' mode)")

    # ---- layout / tiling ---------------------------------------------------
    W_pad = _round_up(W, 128)                      # lane-dense width
    HALO = _round_up(KH - 1, 8) if KH > 1 else 0   # sublane-aligned row halo

    if band_rows is None:
        # Keep each (band x W_pad) f32 block under ~2 MiB so the
        # double-buffered in+out working set stays far inside v7x's 64 MiB
        # physical VMEM (and the 32 MiB scoped limit requested below).  Bigger
        # bands buy nothing: this kernel is HBM-bandwidth bound.
        rows_budget = max(8, ((2 * 1024 * 1024) // (4 * W_pad)) // 8 * 8)
        band_rows = min(_round_up(OH, 8), 512, rows_budget)
    TM = max(8, _round_up(band_rows, 8))
    nb = -(-OH // TM)            # number of output row bands (grid size)
    OH_pad = nb * TM
    H_pad = OH_pad + HALO        # padded input rows cover the last band's halo

    # Small images: whole padded image resident in VMEM (one DMA, cheapest).
    # Tall images: stream overlapping (TM + HALO)-row bands via element-offset
    # blocks so the BlockSpec pipeline double-buffers band i+1 behind band i.
    resident = H_pad * W_pad * 4 <= 8 * 1024 * 1024
    if resident:
        x_spec = pl.BlockSpec((H_pad, W_pad), lambda i: (0, 0))
    else:
        x_spec = pl.BlockSpec((pl.Element(TM + HALO), W_pad),
                              lambda i: (i * TM, 0))

    roll_like_numpy = _roll_moves_to_higher_lanes()

    def lane_shift(b):           # roll amount realizing out[:, j] = x[:, j + b]
        return (W_pad - b) if roll_like_numpy else b

    def kernel(x_ref, f_ref, o_ref):
        # Filter taps: SMEM -> scalars once, before the hot MAC loop.
        taps = [[f_ref[a, b] for b in range(KW)] for a in range(KH)]

        if resident and nb > 1:
            base = pl.multiple_of(pl.program_id(0) * TM, TM)
        else:
            base = 0   # banded path: BlockSpec already delivered band + halo

        # One aligned window load per band; filter-row offset `a` is a
        # sublane-only shift of that window, filter-column offset `b` is an
        # XLU lane roll.  Accumulate full-width in f32.
        win = x_ref[pl.ds(base, TM + HALO), :].astype(jnp.float32)
        acc = jnp.zeros((TM, W_pad), jnp.float32)
        for a in range(KH):
            rows = win[a:a + TM, :]
            part = rows * taps[a][0]
            for b in range(1, KW):
                # Wrapped-around lanes only land at j >= W_pad - b >= OW; they
                # are sliced off in the wrapper.
                part = part + pltpu.roll(rows, shift=lane_shift(b), axis=1) * taps[a][b]
            acc = acc + part
        o_ref[...] = acc.astype(o_ref.dtype)   # full-width, unmasked store

    conv = pl.pallas_call(
        kernel,
        out_shape=jax.ShapeDtypeStruct((OH_pad, W_pad), dtype),
        grid=(nb,),
        in_specs=[
            x_spec,
            pl.BlockSpec(memory_space=pltpu.MemorySpace.SMEM),   # filter taps
        ],
        out_specs=pl.BlockSpec((TM, W_pad), lambda i: (i, 0)),
        compiler_params=pltpu.CompilerParams(
            dimension_semantics=("parallel",),     # band axis -> 2 TCs on v7x
            vmem_limit_bytes=32 * 1024 * 1024,     # above v5e's 16 MiB default
        ),
    )

    @jax.jit
    def forward(x, filt):
        x_pad = jnp.pad(x, ((0, H_pad - H), (0, W_pad - W)))
        out = conv(x_pad, filt.astype(jnp.float32))
        return out[:OH, :OW].astype(dtype)

    return forward


def scipy_conv2d_forward(x, filt, band_rows=None):
    """Equivalent of ScipyConv2d(kh, kw).forward(x): valid 2-D cross-correlation."""
    H, W = x.shape
    KH, KW = filt.shape
    fwd = _build_correlate2d_valid(
        int(H), int(W), int(KH), int(KW), jnp.dtype(x.dtype).name,
        None if band_rows is None else int(band_rows))
    return fwd(x, filt)


def _reference(x, filt):
    # Pure-JAX reference: scipy.signal.correlate2d(x, filt, mode='valid').
    H, W = x.shape
    KH, KW = filt.shape
    OH, OW = H - KH + 1, W - KW + 1
    out = jnp.zeros((OH, OW), jnp.float32)
    for a in range(KH):
        for b in range(KW):
            out = out + x[a:a + OH, b:b + OW] * filt[a, b]
    return out


if __name__ == "__main__":
    key = jax.random.PRNGKey(0)
    k_x, k_f, k_x2 = jax.random.split(key, 3)

    # ScipyConv2d(3, 3) applied to a single 2-D image (tutorial uses 10x10).
    x = jax.random.normal(k_x, (16, 16), dtype=jnp.float32)
    filt = jax.random.normal(k_f, (3, 3), dtype=jnp.float32)

    out = jax.block_until_ready(scipy_conv2d_forward(x, filt))
    ref = _reference(x, filt)
    assert out.shape == (14, 14)
    assert jnp.allclose(out, ref, atol=1e-4, rtol=1e-4)

    # Also exercise the multi-band grid path and >128-lane widths.
    x2 = jax.random.normal(k_x2, (40, 200), dtype=jnp.float32)
    out2 = jax.block_until_ready(scipy_conv2d_forward(x2, filt, band_rows=16))
    ref2 = _reference(x2, filt)
    assert out2.shape == (38, 198)
    assert jnp.allclose(out2, ref2, atol=1e-4, rtol=1e-4)

    print("KERNEL_OK")
</pallas_src>

<mosaic_0001>
module attributes {stable_mosaic.version = 11 : i64} {
  func.func @probe(%arg0: memref<8x128xf32, #tpu.memory_space<vmem>>, %arg1: memref<8x128xf32, #tpu.memory_space<vmem>>) attributes {dimension_semantics = [], scalar_prefetch = 0 : i64, scratch_operands = 0 : i64, tpu.core_type = #tpu.core_type<tc>} {
    %c0 = arith.constant 0 : index
    %c0_0 = arith.constant 0 : index
    %0 = vector.load %arg0[%c0, %c0_0] : memref<8x128xf32, #tpu.memory_space<vmem>>, vector<8x128xf32>
    %c1_i32 = arith.constant 1 : i32
    %1 = tpu.dynamic_rotate %0 by %c1_i32 dim 1 : vector<8x128xf32>, i32 -> vector<8x128xf32>
    %c0_1 = arith.constant 0 : index
    %c0_2 = arith.constant 0 : index
    %2 = vector.load %arg1[%c0_1, %c0_2] : memref<8x128xf32, #tpu.memory_space<vmem>>, vector<8x128xf32>
    tpu.vector_store %arg1[%c0_1, %c0_2], %1 {strides = array<i32>} : memref<8x128xf32, #tpu.memory_space<vmem>>, vector<8x128xf32>,
    return
  }
}

</mosaic_0001>

<bundles_post_ra>
// kernel: tpu_custom_call.1
= control target key start
LH: loop header
LB: loop body
LE: loop exit
PB: predicated region body
PF: predicated region fallthrough
CT: control target
= control target key end

     0   :  { %6 = vsyncpa [#allocation3], 0  ;;  %s106_s0 = inlined_call_operand.hbm [shape: f32[8,128], index: 0, kind: input, shape index: {}]   ;;  %s107_s1 = inlined_call_operand.hbm [shape: f32[8,128], index: 1, kind: output, shape index: {}]  }
   0x1   :  { %7 = vsyncpa [#allocation4], 0  ;;  %s87_s6 = smov [#allocation2]  }
   0x2   :  { %s14_s7 = sshll.u32 %s87_s6, 4  ;;  %s15_s7 = int_to_ptr.vmem [resolvable:$true] %s14_s7 }
   0x3   :  { %s51_s8 = scalar_lea.vmem %s15_s7, 128  ;;  %p56_p1 = scmp.lt.s32.totalorder %s15_s7, %s15_s7 }
   0x4   :  { %p52_p0 = scmp.ne.s32.totalorder %s15_s7, %s51_s8  ;;  %p57_p2 = scmp.lt.s32.totalorder %s51_s8, %s51_s8 }
   0x6   :  { %p58_p3 = por %p57_p2, %p56_p1 }
   0x8   :  { %p59_p4 = pnand %p58_p3, %p52_p0 }
   0xa   :  { %62 = shalt.err (!%p59_p4)
}
   0xb   :  { %17 = dma.hbm_to_vmem [thread:$0]  %s106_s0, 128, %s15_s7, [#allocation3]  }
   0xc   :  { %83 = dma.done.wait [#allocation3], 128  }
   0xd   :  { %84 = vsyncadd [#allocation3], 4294967168  ;;  %v21_v0 = vld [vmem:[#allocation2] sm:$0xff]  ;;  %s88_s11 = smov 1   ;;  %s89_s12 = smov [#allocation5]  }
   0xe   :  { %22 = vrot.lane.b32.xlu0 %v21_v0, %s88_s11  ;;  %s31_s13 = sshll.u32 %s89_s12, 4  ;;  %s32_s13 = int_to_ptr.vmem [resolvable:$true] %s31_s13 }
   0xf   :  { %s63_s14 = scalar_lea.vmem %s32_s13, 128  ;;  %p68_p6 = scmp.lt.s32.totalorder %s32_s13, %s32_s13 }
  0x10   :  { %p64_p5 = scmp.ne.s32.totalorder %s32_s13, %s63_s14  ;;  %p69_p7 = scmp.lt.s32.totalorder %s63_s14, %s63_s14 }
  0x12   :  { %p70_p8 = por %p69_p7, %p68_p6 }
  0x14   :  { %p71_p9 = pnand %p70_p8, %p64_p5 }
  0x80   :  { %v23_v1 = vpop.permute.xlu0 %22 }
  0x81   :  { %24 = vst [vmem:[#allocation5] sm:$0xff] %v23_v1 }
  0x82   :  { %74 = shalt.err (!%p71_p9)
}
  0x83   :  { %34 = dma.vmem_to_hbm [thread:$0]  %s32_s13, 128, %s107_s1, [#allocation4]  }
  0x84   :  { %85 = dma.done.wait [#allocation4], 128  }
  0x85   :  { %86 = vsyncadd [#allocation4], 4294967168 }
  0x86   :  { %38 = vsyncpa [#allocation3], 1 }
  0x87   :  { %39 = vsyncpa [#allocation4], 1 }

</bundles_post_ra>
